<compile_context>
chip_gen: v6e
topology: v6e:2x2x1
jax: 0.10.0
libtpu: 0.0.40
codegen_flags: <defaults>
</compile_context>

<pallas_src>
import functools
import math

import jax
import jax.numpy as jnp
from jax.experimental import pallas as pl
from jax.experimental.pallas import tpu as pltpu

_LANE = 128     # lane width of a vreg (last dim)
_SUBLANE = 8    # fp32 sublane tile (second-to-last dim)


def _round_up(x, m):
    return (x + m - 1) // m * m


def _pad2(a, rows, cols):
    return jnp.pad(a, ((0, rows - a.shape[0]), (0, cols - a.shape[1])))


def _make_decoder_kernel(num_layers: int, b_p: int, dim_p: int):
    """One LSTM decode step (all layers) + vocab projection, fully in VMEM."""

    def kernel(*refs):
        # inputs : x, h0, c0, W_0..W_{L-1}, b_0..b_{L-1}, w_out, b_out
        # outputs: char, x_out, h_out, c_out
        x_ref, h0_ref, c0_ref = refs[0], refs[1], refs[2]
        w_refs = refs[3:3 + num_layers]
        b_refs = refs[3 + num_layers:3 + 2 * num_layers]
        w_out_ref = refs[3 + 2 * num_layers]
        b_out_ref = refs[3 + 2 * num_layers + 1]
        char_ref, xout_ref, hout_ref, cout_ref = refs[3 + 2 * num_layers + 2:]

        layer_in = x_ref[...]                                   # (b_p, in_p)
        for l in range(num_layers):
            # 8-aligned per-layer slabs -> full-tile loads/stores.
            h_prev = h0_ref[l * b_p:(l + 1) * b_p, :]           # (b_p, dim_p)
            c_prev = c0_ref[l * b_p:(l + 1) * b_p, :]           # (b_p, dim_p)

            # Fused gate matmul: [x | h_prev] @ [W_ih ; W_hh] + (b_ih + b_hh).
            xin = jnp.concatenate([layer_in, h_prev], axis=1)   # (b_p, in_p+dim_p)
            gates = (
                jnp.dot(xin, w_refs[l][...], preferred_element_type=jnp.float32)
                + b_refs[l][...]
            )                                                   # (b_p, 4*dim_p)

            # PyTorch LSTM gate order: input, forget, cell(g), output.
            # Each gate occupies its own 128-lane-aligned block -> free slices.
            i_g = jax.nn.sigmoid(gates[:, 0 * dim_p:1 * dim_p])
            f_g = jax.nn.sigmoid(gates[:, 1 * dim_p:2 * dim_p])
            g_g = jnp.tanh(gates[:, 2 * dim_p:3 * dim_p])
            o_g = jax.nn.sigmoid(gates[:, 3 * dim_p:4 * dim_p])

            c_new = f_g * c_prev + i_g * g_g
            h_new = o_g * jnp.tanh(c_new)

            hout_ref[l * b_p:(l + 1) * b_p, :] = h_new
            cout_ref[l * b_p:(l + 1) * b_p, :] = c_new

            # inter-layer dropout is identity in eval mode
            layer_in = h_new

        # char projection (final_dropout is identity in eval); lane-dense store.
        char_ref[...] = (
            jnp.dot(layer_in, w_out_ref[...], preferred_element_type=jnp.float32)
            + b_out_ref[...]
        )
        xout_ref[...] = layer_in

    return kernel


def pack_decoder_params(params, *, input_dim, vocab_size, dim, num_layers):
    """Host-side one-time packing: fuse W_ih/W_hh + biases, pad to (8,128) tiles.

    Packed per-layer weight W_l has shape (in_l_p + dim_p, 4*dim_p) with each
    gate's columns placed in its own 128-lane block (zero padded).
    """
    dim_p = _round_up(dim, _LANE)
    vocab_p = _round_up(vocab_size, _LANE)
    packed = {}
    for l in range(num_layers):
        in_l = input_dim if l == 0 else dim
        in_l_p = _round_up(in_l, _LANE)
        w_ih = params[f"w_ih_{l}"]                   # (in_l, 4*dim)
        w_hh = params[f"w_hh_{l}"]                   # (dim, 4*dim)
        b_fused = params[f"b_ih_{l}"] + params[f"b_hh_{l}"]   # (4*dim,)

        gate_cols, gate_bias = [], []
        for g in range(4):
            wx = w_ih[:, g * dim:(g + 1) * dim]      # (in_l, dim)
            wh = w_hh[:, g * dim:(g + 1) * dim]      # (dim, dim)
            col = jnp.concatenate(
                [_pad2(wx, in_l_p, dim_p), _pad2(wh, dim_p, dim_p)], axis=0)
            gate_cols.append(col)                    # (in_l_p + dim_p, dim_p)
            gate_bias.append(
                jnp.pad(b_fused[g * dim:(g + 1) * dim], (0, dim_p - dim)))
        packed[f"w_{l}"] = jnp.concatenate(gate_cols, axis=1)   # (in_l_p+dim_p, 4*dim_p)
        packed[f"b_{l}"] = jnp.concatenate(gate_bias)[None, :]  # (1, 4*dim_p)

    packed["w_out"] = _pad2(params["w_out"], dim_p, vocab_p)    # (dim_p, vocab_p)
    packed["b_out"] = jnp.pad(
        params["b_out"], (0, vocab_p - vocab_size))[None, :]    # (1, vocab_p)
    return packed


def decoder_forward(x, h0, c0, packed, *, num_layers, dim, vocab_size):
    """One decode step.

    Args:
      x:  (B, input_dim) float32
      h0: (num_layers, B, dim) float32
      c0: (num_layers, B, dim) float32
      packed: output of pack_decoder_params.
    Returns:
      char: (B, vocab_size), x_out: (B, dim),
      h_new: (num_layers, B, dim), c_new: (num_layers, B, dim)
    """
    B, input_dim = x.shape
    b_p = _round_up(B, _SUBLANE)
    dim_p = _round_up(dim, _LANE)
    in_p = _round_up(input_dim, _LANE)
    vocab_p = _round_up(vocab_size, _LANE)

    # Zero-pad activations/state to (8,128)-aligned, lane-dense tiles.
    x_p = _pad2(x, b_p, in_p)
    h0_p = jnp.pad(h0, ((0, 0), (0, b_p - B), (0, dim_p - dim))
                   ).reshape(num_layers * b_p, dim_p)
    c0_p = jnp.pad(c0, ((0, 0), (0, b_p - B), (0, dim_p - dim))
                   ).reshape(num_layers * b_p, dim_p)

    inputs = [x_p, h0_p, c0_p]
    inputs += [packed[f"w_{l}"] for l in range(num_layers)]
    inputs += [packed[f"b_{l}"] for l in range(num_layers)]
    inputs += [packed["w_out"], packed["b_out"]]
    n_in = len(inputs)

    out_shapes = (
        jax.ShapeDtypeStruct((b_p, vocab_p), jnp.float32),             # char
        jax.ShapeDtypeStruct((b_p, dim_p), jnp.float32),               # x_out
        jax.ShapeDtypeStruct((num_layers * b_p, dim_p), jnp.float32),  # h_new
        jax.ShapeDtypeStruct((num_layers * b_p, dim_p), jnp.float32),  # c_new
    )

    kernel = _make_decoder_kernel(num_layers, b_p, dim_p)

    # Small problem: everything fits VMEM -> single gridless call.
    # h/c state buffers are updated in place (input 1 -> output 2, input 2 -> output 3).
    char_p, x_out_p, h_p, c_p = pl.pallas_call(
        kernel,
        out_shape=out_shapes,
        in_specs=[pl.BlockSpec(memory_space=pltpu.VMEM)] * n_in,
        out_specs=tuple(pl.BlockSpec(memory_space=pltpu.VMEM) for _ in range(4)),
        input_output_aliases={1: 2, 2: 3},
    )(*inputs)

    char = char_p[:B, :vocab_size]
    x_out = x_out_p[:B, :dim]
    h_new = h_p.reshape(num_layers, b_p, dim_p)[:, :B, :dim]
    c_new = c_p.reshape(num_layers, b_p, dim_p)[:, :B, :dim]
    return char, x_out, h_new, c_new


def init_decoder_params(key, input_dim, vocab_size, dim, num_layers):
    """Deterministic init matching PyTorch shapes; weights stored as [in, out]."""
    params = {}
    k = 1.0 / math.sqrt(dim)
    keys = jax.random.split(key, 4 * num_layers + 2)
    ki = 0
    for l in range(num_layers):
        in_l = input_dim if l == 0 else dim
        params[f"w_ih_{l}"] = jax.random.uniform(
            keys[ki], (in_l, 4 * dim), jnp.float32, -k, k); ki += 1
        params[f"w_hh_{l}"] = jax.random.uniform(
            keys[ki], (dim, 4 * dim), jnp.float32, -k, k); ki += 1
        params[f"b_ih_{l}"] = jax.random.uniform(
            keys[ki], (4 * dim,), jnp.float32, -k, k); ki += 1
        params[f"b_hh_{l}"] = jax.random.uniform(
            keys[ki], (4 * dim,), jnp.float32, -k, k); ki += 1
    kl = 1.0 / math.sqrt(dim)
    params["w_out"] = jax.random.uniform(
        keys[ki], (dim, vocab_size), jnp.float32, -kl, kl); ki += 1
    params["b_out"] = jax.random.uniform(
        keys[ki], (vocab_size,), jnp.float32, -kl, kl); ki += 1
    return params


def _reference_forward(x, h0, c0, params, num_layers, dim, vocab_size):
    """Pure-JAX reference for correctness checking (unpacked f32 weights)."""
    layer_in = x
    h_new, c_new = [], []
    for l in range(num_layers):
        gates = (layer_in @ params[f"w_ih_{l}"] + params[f"b_ih_{l}"]
                 + h0[l] @ params[f"w_hh_{l}"] + params[f"b_hh_{l}"])
        i_g = jax.nn.sigmoid(gates[:, 0 * dim:1 * dim])
        f_g = jax.nn.sigmoid(gates[:, 1 * dim:2 * dim])
        g_g = jnp.tanh(gates[:, 2 * dim:3 * dim])
        o_g = jax.nn.sigmoid(gates[:, 3 * dim:4 * dim])
        c = f_g * c0[l] + i_g * g_g
        h = o_g * jnp.tanh(c)
        h_new.append(h)
        c_new.append(c)
        layer_in = h
    char = layer_in @ params["w_out"] + params["b_out"]
    return char, layer_in, jnp.stack(h_new), jnp.stack(c_new)


if __name__ == "__main__":
    # Small shapes consistent with Decoder.forward: x is (B, input_dim).
    B = 2
    INPUT_DIM = 32
    DIM = 32
    VOCAB = 40
    NUM_LAYERS = 2

    key = jax.random.PRNGKey(0)
    k_params, k_x, k_h, k_c = jax.random.split(key, 4)

    params = init_decoder_params(k_params, INPUT_DIM, VOCAB, DIM, NUM_LAYERS)
    packed = pack_decoder_params(
        params, input_dim=INPUT_DIM, vocab_size=VOCAB, dim=DIM,
        num_layers=NUM_LAYERS)

    x = jax.random.normal(k_x, (B, INPUT_DIM), jnp.float32)
    # init_state equivalent: zeros; use small random values to exercise recurrence.
    h0 = jax.random.normal(k_h, (NUM_LAYERS, B, DIM), jnp.float32) * 0.1
    c0 = jax.random.normal(k_c, (NUM_LAYERS, B, DIM), jnp.float32) * 0.1

    fwd = jax.jit(functools.partial(
        decoder_forward, num_layers=NUM_LAYERS, dim=DIM, vocab_size=VOCAB))

    char, x_out, h_new, c_new = jax.block_until_ready(fwd(x, h0, c0, packed))

    # Correctness check against pure-JAX reference (unpacked weights).
    char_r, x_r, h_r, c_r = _reference_forward(
        x, h0, c0, params, NUM_LAYERS, DIM, VOCAB)
    assert jnp.allclose(char, char_r, atol=1e-4, rtol=1e-4)
    assert jnp.allclose(x_out, x_r, atol=1e-4, rtol=1e-4)
    assert jnp.allclose(h_new, h_r, atol=1e-4, rtol=1e-4)
    assert jnp.allclose(c_new, c_r, atol=1e-4, rtol=1e-4)

    print("KERNEL_OK")
</pallas_src>

<mosaic_0001>
module attributes {stable_mosaic.version = 11 : i64} {
  func.func @kernel(%arg0: memref<8x128xf32, #tpu.memory_space<vmem>>, %arg1: memref<16x128xf32, #tpu.memory_space<vmem>>, %arg2: memref<16x128xf32, #tpu.memory_space<vmem>>, %arg3: memref<256x512xf32, #tpu.memory_space<vmem>>, %arg4: memref<256x512xf32, #tpu.memory_space<vmem>>, %arg5: memref<1x512xf32, #tpu.memory_space<vmem>>, %arg6: memref<1x512xf32, #tpu.memory_space<vmem>>, %arg7: memref<128x128xf32, #tpu.memory_space<vmem>>, %arg8: memref<1x128xf32, #tpu.memory_space<vmem>>, %arg9: memref<8x128xf32, #tpu.memory_space<vmem>>, %arg10: memref<8x128xf32, #tpu.memory_space<vmem>>, %arg11: memref<16x128xf32, #tpu.memory_space<vmem>>, %arg12: memref<16x128xf32, #tpu.memory_space<vmem>>) attributes {dimension_semantics = [], scalar_prefetch = 0 : i64, scratch_operands = 0 : i64, tpu.core_type = #tpu.core_type<tc>} {
    %c0 = arith.constant 0 : index
    %c0_0 = arith.constant 0 : index
    %0 = vector.load %arg0[%c0, %c0_0] : memref<8x128xf32, #tpu.memory_space<vmem>>, vector<8x128xf32>
    %c0_1 = arith.constant 0 : index
    %c0_2 = arith.constant 0 : index
    %1 = vector.load %arg1[%c0_1, %c0_2] : memref<16x128xf32, #tpu.memory_space<vmem>>, vector<8x128xf32>
    %c0_3 = arith.constant 0 : index
    %c0_4 = arith.constant 0 : index
    %2 = vector.load %arg2[%c0_3, %c0_4] : memref<16x128xf32, #tpu.memory_space<vmem>>, vector<8x128xf32>
    %3 = tpu.concatenate %0, %1 in 1 : vector<8x128xf32>, vector<8x128xf32> -> vector<8x256xf32>
    %c0_5 = arith.constant 0 : index
    %c0_6 = arith.constant 0 : index
    %4 = vector.load %arg3[%c0_5, %c0_6] : memref<256x512xf32, #tpu.memory_space<vmem>>, vector<256x512xf32>
    %cst = arith.constant dense<0.000000e+00> : vector<8x512xf32>
    %5 = tpu.matmul %3, %4, %cst {dimension_numbers = #tpu.dot_dimension_numbers<[1], [0], [0], [1], [0, 0, 1, 1], [], []>} : vector<8x256xf32>, vector<256x512xf32>, vector<8x512xf32> -> vector<8x512xf32>
    %c0_7 = arith.constant 0 : index
    %c0_8 = arith.constant 0 : index
    %6 = vector.load %arg5[%c0_7, %c0_8] : memref<1x512xf32, #tpu.memory_space<vmem>>, vector<1x512xf32>
    %7 = vector.broadcast %6 : vector<1x512xf32> to vector<8x512xf32>
    %8 = arith.addf %5, %7 : vector<8x512xf32>
    %9 = vector.extract_strided_slice %8 {offsets = [0, 0], sizes = [8, 128], strides = [1, 1]} : vector<8x512xf32> to vector<8x128xf32>
    %10 = arith.negf %9 : vector<8x128xf32>
    %11 = math.exp %10 : vector<8x128xf32>
    %cst_9 = arith.constant 1.000000e+00 : f32
    %12 = vector.broadcast %cst_9 : f32 to vector<8x128xf32>
    %13 = arith.addf %12, %11 : vector<8x128xf32>
    %14 = arith.divf %12, %13 : vector<8x128xf32>
    %15 = vector.extract_strided_slice %8 {offsets = [0, 128], sizes = [8, 128], strides = [1, 1]} : vector<8x512xf32> to vector<8x128xf32>
    %16 = arith.negf %15 : vector<8x128xf32>
    %17 = math.exp %16 : vector<8x128xf32>
    %cst_10 = arith.constant 1.000000e+00 : f32
    %18 = vector.broadcast %cst_10 : f32 to vector<8x128xf32>
    %19 = arith.addf %18, %17 : vector<8x128xf32>
    %20 = arith.divf %18, %19 : vector<8x128xf32>
    %21 = vector.extract_strided_slice %8 {offsets = [0, 256], sizes = [8, 128], strides = [1, 1]} : vector<8x512xf32> to vector<8x128xf32>
    %22 = math.tanh %21 : vector<8x128xf32>
    %23 = vector.extract_strided_slice %8 {offsets = [0, 384], sizes = [8, 128], strides = [1, 1]} : vector<8x512xf32> to vector<8x128xf32>
    %24 = arith.negf %23 : vector<8x128xf32>
    %25 = math.exp %24 : vector<8x128xf32>
    %cst_11 = arith.constant 1.000000e+00 : f32
    %26 = vector.broadcast %cst_11 : f32 to vector<8x128xf32>
    %27 = arith.addf %26, %25 : vector<8x128xf32>
    %28 = arith.divf %26, %27 : vector<8x128xf32>
    %29 = arith.mulf %20, %2 : vector<8x128xf32>
    %30 = arith.mulf %14, %22 : vector<8x128xf32>
    %31 = arith.addf %29, %30 : vector<8x128xf32>
    %32 = math.tanh %31 : vector<8x128xf32>
    %33 = arith.mulf %28, %32 : vector<8x128xf32>
    %c0_12 = arith.constant 0 : index
    %c0_13 = arith.constant 0 : index
    %34 = vector.load %arg11[%c0_12, %c0_13] : memref<16x128xf32, #tpu.memory_space<vmem>>, vector<8x128xf32>
    tpu.vector_store %arg11[%c0_12, %c0_13], %33 {strides = array<i32>} : memref<16x128xf32, #tpu.memory_space<vmem>>, vector<8x128xf32>,
    %c0_14 = arith.constant 0 : index
    %c0_15 = arith.constant 0 : index
    %35 = vector.load %arg12[%c0_14, %c0_15] : memref<16x128xf32, #tpu.memory_space<vmem>>, vector<8x128xf32>
    tpu.vector_store %arg12[%c0_14, %c0_15], %31 {strides = array<i32>} : memref<16x128xf32, #tpu.memory_space<vmem>>, vector<8x128xf32>,
    %c8 = arith.constant 8 : index
    %c0_16 = arith.constant 0 : index
    %36 = vector.load %arg1[%c8, %c0_16] : memref<16x128xf32, #tpu.memory_space<vmem>>, vector<8x128xf32>
    %c8_17 = arith.constant 8 : index
    %c0_18 = arith.constant 0 : index
    %37 = vector.load %arg2[%c8_17, %c0_18] : memref<16x128xf32, #tpu.memory_space<vmem>>, vector<8x128xf32>
    %38 = tpu.concatenate %33, %36 in 1 : vector<8x128xf32>, vector<8x128xf32> -> vector<8x256xf32>
    %c0_19 = arith.constant 0 : index
    %c0_20 = arith.constant 0 : index
    %39 = vector.load %arg4[%c0_19, %c0_20] : memref<256x512xf32, #tpu.memory_space<vmem>>, vector<256x512xf32>
    %cst_21 = arith.constant dense<0.000000e+00> : vector<8x512xf32>
    %40 = tpu.matmul %38, %39, %cst_21 {dimension_numbers = #tpu.dot_dimension_numbers<[1], [0], [0], [1], [0, 0, 1, 1], [], []>} : vector<8x256xf32>, vector<256x512xf32>, vector<8x512xf32> -> vector<8x512xf32>
    %c0_22 = arith.constant 0 : index
    %c0_23 = arith.constant 0 : index
    %41 = vector.load %arg6[%c0_22, %c0_23] : memref<1x512xf32, #tpu.memory_space<vmem>>, vector<1x512xf32>
    %42 = vector.broadcast %41 : vector<1x512xf32> to vector<8x512xf32>
    %43 = arith.addf %40, %42 : vector<8x512xf32>
    %44 = vector.extract_strided_slice %43 {offsets = [0, 0], sizes = [8, 128], strides = [1, 1]} : vector<8x512xf32> to vector<8x128xf32>
    %45 = arith.negf %44 : vector<8x128xf32>
    %46 = math.exp %45 : vector<8x128xf32>
    %cst_24 = arith.constant 1.000000e+00 : f32
    %47 = vector.broadcast %cst_24 : f32 to vector<8x128xf32>
    %48 = arith.addf %47, %46 : vector<8x128xf32>
    %49 = arith.divf %47, %48 : vector<8x128xf32>
    %50 = vector.extract_strided_slice %43 {offsets = [0, 128], sizes = [8, 128], strides = [1, 1]} : vector<8x512xf32> to vector<8x128xf32>
    %51 = arith.negf %50 : vector<8x128xf32>
    %52 = math.exp %51 : vector<8x128xf32>
    %cst_25 = arith.constant 1.000000e+00 : f32
    %53 = vector.broadcast %cst_25 : f32 to vector<8x128xf32>
    %54 = arith.addf %53, %52 : vector<8x128xf32>
    %55 = arith.divf %53, %54 : vector<8x128xf32>
    %56 = vector.extract_strided_slice %43 {offsets = [0, 256], sizes = [8, 128], strides = [1, 1]} : vector<8x512xf32> to vector<8x128xf32>
    %57 = math.tanh %56 : vector<8x128xf32>
    %58 = vector.extract_strided_slice %43 {offsets = [0, 384], sizes = [8, 128], strides = [1, 1]} : vector<8x512xf32> to vector<8x128xf32>
    %59 = arith.negf %58 : vector<8x128xf32>
    %60 = math.exp %59 : vector<8x128xf32>
    %cst_26 = arith.constant 1.000000e+00 : f32
    %61 = vector.broadcast %cst_26 : f32 to vector<8x128xf32>
    %62 = arith.addf %61, %60 : vector<8x128xf32>
    %63 = arith.divf %61, %62 : vector<8x128xf32>
    %64 = arith.mulf %55, %37 : vector<8x128xf32>
    %65 = arith.mulf %49, %57 : vector<8x128xf32>
    %66 = arith.addf %64, %65 : vector<8x128xf32>
    %67 = math.tanh %66 : vector<8x128xf32>
    %68 = arith.mulf %63, %67 : vector<8x128xf32>
    %c8_27 = arith.constant 8 : index
    %c0_28 = arith.constant 0 : index
    %69 = vector.load %arg11[%c8_27, %c0_28] : memref<16x128xf32, #tpu.memory_space<vmem>>, vector<8x128xf32>
    tpu.vector_store %arg11[%c8_27, %c0_28], %68 {strides = array<i32>} : memref<16x128xf32, #tpu.memory_space<vmem>>, vector<8x128xf32>,
    %c8_29 = arith.constant 8 : index
    %c0_30 = arith.constant 0 : index
    %70 = vector.load %arg12[%c8_29, %c0_30] : memref<16x128xf32, #tpu.memory_space<vmem>>, vector<8x128xf32>
    tpu.vector_store %arg12[%c8_29, %c0_30], %66 {strides = array<i32>} : memref<16x128xf32, #tpu.memory_space<vmem>>, vector<8x128xf32>,
    %c0_31 = arith.constant 0 : index
    %c0_32 = arith.constant 0 : index
    %71 = vector.load %arg7[%c0_31, %c0_32] : memref<128x128xf32, #tpu.memory_space<vmem>>, vector<128x128xf32>
    %cst_33 = arith.constant dense<0.000000e+00> : vector<8x128xf32>
    %72 = tpu.matmul %68, %71, %cst_33 {dimension_numbers = #tpu.dot_dimension_numbers<[1], [0], [0], [1], [0, 0, 1, 1], [], []>} : vector<8x128xf32>, vector<128x128xf32>, vector<8x128xf32> -> vector<8x128xf32>
    %c0_34 = arith.constant 0 : index
    %c0_35 = arith.constant 0 : index
    %73 = vector.load %arg8[%c0_34, %c0_35] : memref<1x128xf32, #tpu.memory_space<vmem>>, vector<1x128xf32>
    %74 = vector.broadcast %73 : vector<1x128xf32> to vector<8x128xf32>
    %75 = arith.addf %72, %74 : vector<8x128xf32>
    %c0_36 = arith.constant 0 : index
    %c0_37 = arith.constant 0 : index
    %76 = vector.load %arg9[%c0_36, %c0_37] : memref<8x128xf32, #tpu.memory_space<vmem>>, vector<8x128xf32>
    tpu.vector_store %arg9[%c0_36, %c0_37], %75 {strides = array<i32>} : memref<8x128xf32, #tpu.memory_space<vmem>>, vector<8x128xf32>,
    %c0_38 = arith.constant 0 : index
    %c0_39 = arith.constant 0 : index
    %77 = vector.load %arg10[%c0_38, %c0_39] : memref<8x128xf32, #tpu.memory_space<vmem>>, vector<8x128xf32>
    tpu.vector_store %arg10[%c0_38, %c0_39], %68 {strides = array<i32>} : memref<8x128xf32, #tpu.memory_space<vmem>>, vector<8x128xf32>,
    return
  }
}

</mosaic_0001>

<bundles_post_ra>
// kernel: decoder_forward.1
= control target key start
LH: loop header
LB: loop body
LE: loop exit
PB: predicated region body
PF: predicated region fallthrough
CT: control target
= control target key end

     0   :  { %18 = vsyncpa [#allocation3], 0  ;;  %s1142_s0 = inlined_call_operand.vmem [shape: f32[8,128], index: 0, kind: input, shape index: {}]   ;;  %s1143_s1 = inlined_call_operand.vmem [shape: f32[16,128], index: 1, kind: input, shape index: {}, may-alias: {1,11}]   ;;  %s1144_s2 = inlined_call_operand.vmem [shape: f32[16,128], index: 2, kind: input, shape index: {}, may-alias: {2,12}]   ;;  %s1145_s3 = inlined_call_operand.hbm [shape: f32[256,512], index: 3, kind: input, shape index: {}]   ;;  %s1146_s4 = inlined_call_operand.hbm [shape: f32[256,512], index: 4, kind: input, shape index: {}]   ;;  %s1147_s5 = inlined_call_operand.vmem [shape: f32[1,512], index: 5, kind: input, shape index: {}]   ;;  %s1148_s6 = inlined_call_operand.vmem [shape: f32[1,512], index: 6, kind: input, shape index: {}]   ;;  %s1149_s7 = inlined_call_operand.hbm [shape: f32[128,128], index: 7, kind: input, shape index: {}]   ;;  %s1150_s8 = inlined_call_operand.vmem [shape: f32[1,128], index: 8, kind: input, shape index: {}]   ;;  %s1151_s9 = inlined_call_operand.vmem [shape: f32[8,128], index: 9, kind: output, shape index: {0}]   ;;  %s1152_s10 = inlined_call_operand.vmem [shape: f32[8,128], index: 10, kind: output, shape index: {1}]   ;;  %s1153_s11 = inlined_call_operand.vmem [shape: f32[16,128], index: 11, kind: output, shape index: {2}, may-alias: {1,11}]   ;;  %s1154_s12 = inlined_call_operand.vmem [shape: f32[16,128], index: 12, kind: output, shape index: {3}, may-alias: {2,12}]  }
   0x1   :  { %19 = vsyncpa [#allocation5], 0  ;;  %s995_s21 = smov [#allocation4]   ;;  %s996_s23 = smov [#allocation2]  }
   0x2   :  { %s43_s22 = sshll.u32 %s995_s21, 4  ;;  %s31_s24 = sshll.u32 %s996_s23, 4  ;;  %s44_s22 = int_to_ptr.vmem [resolvable:$true] %s43_s22  ;;  %s32_s24 = int_to_ptr.vmem [resolvable:$true] %s31_s24 }
   0x3   :  { %s939_s25 = scalar_lea.vmem %s44_s22, 16384  ;;  %p944_p1 = scmp.lt.s32.totalorder %s44_s22, %s44_s22 }
   0x4   :  { %p940_p0 = scmp.ne.s32.totalorder %s44_s22, %s939_s25  ;;  %p945_p2 = scmp.lt.s32.totalorder %s939_s25, %s939_s25 }
   0x6   :  { %p946_p3 = por %p945_p2, %p944_p1 }
   0x8   :  { %p947_p4 = pnand %p946_p3, %p940_p0 }
   0xa   :  { %950 = shalt.err (!%p947_p4)
}
   0xb   :  { %s997_s26 = smov 512   ;;  %s998_s27 = smov 32  }
   0xc   :  { %49 = dma.hbm_to_vmem [thread:$0]  %s1146_s4, 16384, %s44_s22, [#allocation5], %s997_s26, %s997_s26, %s998_s27  }
   0xd   :  { %s959_s30 = scalar_lea.vmem %s32_s24, 16384  ;;  %p964_p6 = scmp.lt.s32.totalorder %s32_s24, %s32_s24 }
   0xe   :  { %p960_p5 = scmp.ne.s32.totalorder %s32_s24, %s959_s30  ;;  %p965_p7 = scmp.lt.s32.totalorder %s959_s30, %s959_s30 }
  0x10   :  { %p966_p8 = por %p965_p7, %p964_p6 }
  0x12   :  { %p967_p9 = pnand %p966_p8, %p960_p5 }
  0x14   :  { %970 = shalt.err (!%p967_p9)
}
  0x15   :  { %37 = dma.hbm_to_vmem [thread:$0]  %s1145_s3, 16384, %s32_s24, [#allocation3], %s997_s26, %s997_s26, %s998_s27  }
  0x16   :  { %s999_s15 = smov [#allocation6]  }
  0x17   :  { %s59_s16 = sshll.u32 %s999_s15, 4  ;;  %s60_s16 = int_to_ptr.vmem [resolvable:$true] %s59_s16 }
  0x18   :  { %s979_s17 = scalar_lea.vmem %s60_s16, 2048  ;;  %p984_p11 = scmp.lt.s32.totalorder %s60_s16, %s60_s16 }
  0x19   :  { %p980_p10 = scmp.ne.s32.totalorder %s60_s16, %s979_s17  ;;  %p985_p12 = scmp.lt.s32.totalorder %s979_s17, %s979_s17 }
  0x1b   :  { %p986_p13 = por %p985_p12, %p984_p11 }
  0x1d   :  { %p987_p0 = pnand %p986_p13, %p980_p10 }
  0x1f   :  { %990 = shalt.err (!%p987_p0)
}
  0x20   :  { %s1000_s4 = smov 128   ;;  %s1001_s18 = smov 8  }
  0x21   :  { %65 = dma.hbm_to_vmem [thread:$0]  %s1149_s7, 2048, %s60_s16, [#allocation5], %s1000_s4, %s1000_s4, %s1001_s18  }
  0x22   :  { %991 = dma.done.wait [#allocation3], 16384  }
  0x23   :  { %992 = vsyncadd [#allocation3], 4294950912 }
  0x24   :  { %993 = dma.done.wait [#allocation5], 18432  }
  0x25   :  { %994 = vsyncadd [#allocation5], 4294948864  ;;  %v141_v0 = vld [vmem:[#allocation2 + $0x1e8] sm:$0xff]  ;;  %v140_v1 = vld [vmem:[#allocation2 + $0x1e0] sm:$0xff]  ;;  %vm1003_vm0 = vmmov 0  }
  0x26   :  { %v137_v2 = vld [vmem:[#allocation2 + $0x1c8] sm:$0xff]  ;;  %230 = vmatprep.subr.mxu0 %v141_v0  ;;  %v136_v3 = vld [vmem:[#allocation2 + $0x1c0] sm:$0xff]  ;;  %v143_v8 = vld [vmem:[#allocation2 + $0x1f8] sm:$0xff] }
  0x27   :  { %231 = vmatpush1.msra.mxu0 %v140_v1  ;;  %v133_v4 = vld [vmem:[#allocation2 + $0x1a8] sm:$0xff]  ;;  %v132_v5 = vld [vmem:[#allocation2 + $0x1a0] sm:$0xff]  ;;  %301 = vmatprep.subr.mxu1 %v143_v8  ;;  %v142_v10 = vld [vmem:[#allocation2 + $0x1f0] sm:$0xff] }
  0x28   :  { %232 = vmatprep.subr.mxu0 %v137_v2  ;;  %v129_v6 = vld [vmem:[#allocation2 + $0x188] sm:$0xff]  ;;  %v128_v7 = vld [vmem:[#allocation2 + $0x180] sm:$0xff]  ;;  %302 = vmatpush1.msra.mxu1 %v142_v10  ;;  %v139_v12 = vld [vmem:[#allocation2 + $0x1d8] sm:$0xff] }
  0x29   :  { %233 = vmatpush1.msra.mxu0 %v136_v3  ;;  %v125_v9 = vld [vmem:[#allocation2 + $0x168] sm:$0xff]  ;;  %v124_v11 = vld [vmem:[#allocation2 + $0x160] sm:$0xff]  ;;  %v138_v13 = vld [vmem:[#allocation2 + $0x1d0] sm:$0xff]  ;;  %303 = vmatprep.subr.mxu1 %v139_v12 }
  0x2a   :  { %234 = vmatprep.subr.mxu0 %v133_v4  ;;  %v121_v14 = vld [vmem:[#allocation2 + $0x148] sm:$0xff]  ;;  %v135_v15 = vld [vmem:[#allocation2 + $0x1b8] sm:$0xff]  ;;  %v120_v16 = vld [vmem:[#allocation2 + $0x140] sm:$0xff]  ;;  %304 = vmatpush1.msra.mxu1 %v138_v13 }
  0x2b   :  { %235 = vmatpush1.msra.mxu0 %v132_v5  ;;  %v134_v17 = vld [vmem:[#allocation2 + $0x1b0] sm:$0xff]  ;;  %v131_v18 = vld [vmem:[#allocation2 + $0x198] sm:$0xff]  ;;  %v117_v19 = vld [vmem:[#allocation2 + $0x128] sm:$0xff]  ;;  %305 = vmatprep.subr.mxu1 %v135_v15 }
  0x2c   :  { %236 = vmatprep.subr.mxu0 %v129_v6  ;;  %v130_v20 = vld [vmem:[#allocation2 + $0x190] sm:$0xff]  ;;  %v116_v21 = vld [vmem:[#allocation2 + $0x120] sm:$0xff]  ;;  %306 = vmatpush1.msra.mxu1 %v134_v17  ;;  %v127_v22 = vld [vmem:[#allocation2 + $0x178] sm:$0xff] }
  0x2d   :  { %237 = vmatpush1.msra.mxu0 %v128_v7  ;;  %v113_v23 = vld [vmem:[#allocation2 + $0x108] sm:$0xff]  ;;  %307 = vmatprep.subr.mxu1 %v131_v18  ;;  %v126_v24 = vld [vmem:[#allocation2 + $0x170] sm:$0xff]  ;;  %v112_v25 = vld [vmem:[#allocation2 + $0x100] sm:$0xff] }
  0x2e   :  { %238 = vmatprep.subr.mxu0 %v125_v9  ;;  %308 = vmatpush1.msra.mxu1 %v130_v20  ;;  %v123_v26 = vld [vmem:[#allocation2 + $0x158] sm:$0xff]  ;;  %v109_v27 = vld [vmem:[#allocation2 + $0xe8] sm:$0xff]  ;;  %v122_v28 = vld [vmem:[#allocation2 + $0x150] sm:$0xff] }
  0x2f   :  { %239 = vmatpush1.msra.mxu0 %v124_v11  ;;  %309 = vmatprep.subr.mxu1 %v127_v22  ;;  %v108_v29 = vld [vmem:[#allocation2 + $0xe0] sm:$0xff]  ;;  %v119_v30 = vld [vmem:[#allocation2 + $0x138] sm:$0xff]  ;;  %v105_v31 = vld [vmem:[#allocation2 + $0xc8] sm:$0xff] }
  0x30   :  { %240 = vmatprep.subr.mxu0 %v121_v14  ;;  %310 = vmatpush1.msra.mxu1 %v126_v24  ;;  %v118_v32 = vld [vmem:[#allocation2 + $0x130] sm:$0xff]  ;;  %v104_v33 = vld [vmem:[#allocation2 + $0xc0] sm:$0xff]  ;;  %v115_v34 = vld [vmem:[#allocation2 + $0x118] sm:$0xff] }
  0x31   :  { %241 = vmatpush1.msra.mxu0 %v120_v16  ;;  %311 = vmatprep.subr.mxu1 %v123_v26  ;;  %v101_v35 = vld [vmem:[#allocation2 + $0xa8] sm:$0xff]  ;;  %v114_v36 = vld [vmem:[#allocation2 + $0x110] sm:$0xff]  ;;  %v100_v37 = vld [vmem:[#allocation2 + $0xa0] sm:$0xff] }
  0x32   :  { %242 = vmatprep.subr.mxu0 %v117_v19  ;;  %312 = vmatpush1.msra.mxu1 %v122_v28  ;;  %v111_v38 = vld [vmem:[#allocation2 + $0xf8] sm:$0xff]  ;;  %v97_v39 = vld [vmem:[#allocation2 + $0x88] sm:$0xff]  ;;  %v110_v40 = vld [vmem:[#allocation2 + $0xf0] sm:$0xff] }
  0x33   :  { %243 = vmatpush1.msra.mxu0 %v116_v21  ;;  %313 = vmatprep.subr.mxu1 %v119_v30  ;;  %v96_v41 = vld [vmem:[#allocation2 + $0x80] sm:$0xff]  ;;  %v107_v42 = vld [vmem:[#allocation2 + $0xd8] sm:$0xff]  ;;  %v93_v43 = vld [vmem:[#allocation2 + $0x68] sm:$0xff] }
  0x34   :  { %244 = vmatprep.subr.mxu0 %v113_v23  ;;  %314 = vmatpush1.msra.mxu1 %v118_v32  ;;  %v106_v44 = vld [vmem:[#allocation2 + $0xd0] sm:$0xff]  ;;  %v92_v45 = vld [vmem:[#allocation2 + $0x60] sm:$0xff]  ;;  %v103_v46 = vld [vmem:[#allocation2 + $0xb8] sm:$0xff] }
  0x35   :  { %245 = vmatpush1.msra.mxu0 %v112_v25  ;;  %315 = vmatprep.subr.mxu1 %v115_v34  ;;  %v89_v47 = vld [vmem:[#allocation2 + $0x48] sm:$0xff]  ;;  %v102_v48 = vld [vmem:[#allocation2 + $0xb0] sm:$0xff]  ;;  %v88_v49 = vld [vmem:[#allocation2 + $0x40] sm:$0xff] }
  0x36   :  { %246 = vmatprep.subr.mxu0 %v109_v27  ;;  %316 = vmatpush1.msra.mxu1 %v114_v36  ;;  %v99_v50 = vld [vmem:[#allocation2 + $0x98] sm:$0xff]  ;;  %v85_v51 = vld [vmem:[#allocation2 + $0x28] sm:$0xff]  ;;  %v98_v52 = vld [vmem:[#allocation2 + $0x90] sm:$0xff] }
  0x37   :  { %247 = vmatpush1.msra.mxu0 %v108_v29  ;;  %317 = vmatprep.subr.mxu1 %v111_v38  ;;  %v84_v53 = vld [vmem:[#allocation2 + $0x20] sm:$0xff]  ;;  %v95_v54 = vld [vmem:[#allocation2 + $0x78] sm:$0xff]  ;;  %v81_v55 = vld [vmem:[#allocation2 + $0x8] sm:$0xff] }
  0x38   :  { %248 = vmatprep.subr.mxu0 %v105_v31  ;;  %318 = vmatpush1.msra.mxu1 %v110_v40  ;;  %v94_v56 = vld [vmem:[#allocation2 + $0x70] sm:$0xff]  ;;  %v80_v57 = vld [vmem:[#allocation2] sm:$0xff]  ;;  %v91_v58 = vld [vmem:[#allocation2 + $0x58] sm:$0xff] }
  0x39   :  { %249 = vmatpush1.msra.mxu0 %v104_v33  ;;  %319 = vmatprep.subr.mxu1 %v107_v42  ;;  %v205_v59 = vld [vmem:[#allocation2 + $0x3e8] sm:$0xff]  ;;  %v90_v60 = vld [vmem:[#allocation2 + $0x50] sm:$0xff]  ;;  %v204_v61 = vld [vmem:[#allocation2 + $0x3e0] sm:$0xff] }
  0x3a   :  { %250 = vmatprep.subr.mxu0 %v101_v35  ;;  %320 = vmatpush1.msra.mxu1 %v106_v44  ;;  %v87_v62 = vld [vmem:[#allocation2 + $0x38] sm:$0xff]  ;;  %v201_v63 = vld [vmem:[#allocation2 + $0x3c8] sm:$0xff]  ;;  %v86_v0 = vld [vmem:[#allocation2 + $0x30] sm:$0xff] }
  0x3b   :  { %251 = vmatpush1.msra.mxu0 %v100_v37  ;;  %321 = vmatprep.subr.mxu1 %v103_v46  ;;  %v200_v1 = vld [vmem:[#allocation2 + $0x3c0] sm:$0xff]  ;;  %v83_v2 = vld [vmem:[#allocation2 + $0x18] sm:$0xff]  ;;  %v197_v3 = vld [vmem:[#allocation2 + $0x3a8] sm:$0xff] }
  0x3c   :  { %252 = vmatprep.subr.mxu0 %v97_v39  ;;  %322 = vmatpush1.msra.mxu1 %v102_v48  ;;  %v82_v4 = vld [vmem:[#allocation2 + $0x10] sm:$0xff]  ;;  %v196_v5 = vld [vmem:[#allocation2 + $0x3a0] sm:$0xff]  ;;  %v207_v6 = vld [vmem:[#allocation2 + $0x3f8] sm:$0xff] }
  0x3d   :  { %253 = vmatpush1.msra.mxu0 %v96_v41  ;;  %323 = vmatprep.subr.mxu1 %v99_v50  ;;  %v193_v7 = vld [vmem:[#allocation2 + $0x388] sm:$0xff]  ;;  %v206_v8 = vld [vmem:[#allocation2 + $0x3f0] sm:$0xff]  ;;  %v192_v9 = vld [vmem:[#allocation2 + $0x380] sm:$0xff] }
  0x3e   :  { %254 = vmatprep.subr.mxu0 %v93_v43  ;;  %324 = vmatpush1.msra.mxu1 %v98_v52  ;;  %v203_v10 = vld [vmem:[#allocation2 + $0x3d8] sm:$0xff]  ;;  %v189_v11 = vld [vmem:[#allocation2 + $0x368] sm:$0xff]  ;;  %v202_v12 = vld [vmem:[#allocation2 + $0x3d0] sm:$0xff] }
  0x3f   :  { %255 = vmatpush1.msra.mxu0 %v92_v45  ;;  %325 = vmatprep.subr.mxu1 %v95_v54  ;;  %v188_v13 = vld [vmem:[#allocation2 + $0x360] sm:$0xff]  ;;  %v199_v14 = vld [vmem:[#allocation2 + $0x3b8] sm:$0xff]  ;;  %v185_v15 = vld [vmem:[#allocation2 + $0x348] sm:$0xff] }
  0x40   :  { %256 = vmatprep.subr.mxu0 %v89_v47  ;;  %326 = vmatpush1.msra.mxu1 %v94_v56  ;;  %v198_v16 = vld [vmem:[#allocation2 + $0x3b0] sm:$0xff]  ;;  %v184_v17 = vld [vmem:[#allocation2 + $0x340] sm:$0xff]  ;;  %v195_v18 = vld [vmem:[#allocation2 + $0x398] sm:$0xff] }
  0x41   :  { %257 = vmatpush1.msra.mxu0 %v88_v49  ;;  %327 = vmatprep.subr.mxu1 %v91_v58  ;;  %v181_v19 = vld [vmem:[#allocation2 + $0x328] sm:$0xff]  ;;  %v194_v20 = vld [vmem:[#allocation2 + $0x390] sm:$0xff]  ;;  %v180_v21 = vld [vmem:[#allocation2 + $0x320] sm:$0xff] }
  0x42   :  { %258 = vmatprep.subr.mxu0 %v85_v51  ;;  %328 = vmatpush1.msra.mxu1 %v90_v60  ;;  %v191_v22 = vld [vmem:[#allocation2 + $0x378] sm:$0xff]  ;;  %v177_v23 = vld [vmem:[#allocation2 + $0x308] sm:$0xff]  ;;  %v190_v24 = vld [vmem:[#allocation2 + $0x370] sm:$0xff] }
  0x43   :  { %259 = vmatpush1.msra.mxu0 %v84_v53  ;;  %329 = vmatprep.subr.mxu1 %v87_v62  ;;  %v176_v25 = vld [vmem:[#allocation2 + $0x300] sm:$0xff]  ;;  %v187_v26 = vld [vmem:[#allocation2 + $0x358] sm:$0xff]  ;;  %v173_v27 = vld [vmem:[#allocation2 + $0x2e8] sm:$0xff] }
  0x44   :  { %260 = vmatprep.subr.mxu0 %v81_v55  ;;  %330 = vmatpush1.msra.mxu1 %v86_v0  ;;  %v186_v28 = vld [vmem:[#allocation2 + $0x350] sm:$0xff]  ;;  %v172_v29 = vld [vmem:[#allocation2 + $0x2e0] sm:$0xff]  ;;  %v183_v30 = vld [vmem:[#allocation2 + $0x338] sm:$0xff] }
  0x45   :  { %261 = vmatpush1.msra.mxu0 %v80_v57  ;;  %331 = vmatprep.subr.mxu1 %v83_v2  ;;  %v169_v31 = vld [vmem:[#allocation2 + $0x2c8] sm:$0xff]  ;;  %v182_v32 = vld [vmem:[#allocation2 + $0x330] sm:$0xff]  ;;  %v168_v33 = vld [vmem:[#allocation2 + $0x2c0] sm:$0xff] }
  0x46   :  { %262 = vmatprep.subr.mxu0 %v205_v59  ;;  %332 = vmatpush1.msra.mxu1 %v82_v4  ;;  %v179_v34 = vld [vmem:[#allocation2 + $0x318] sm:$0xff]  ;;  %v165_v35 = vld [vmem:[#allocation2 + $0x2a8] sm:$0xff]  ;;  %v78_v36 = vld [vmem:[%s1143_s1] sm:$0xff] }
  0x47   :  { %263 = vmatpush2.msra.mxu0 %v204_v61  ;;  %333 = vmatprep.subr.mxu1 %v207_v6  ;;  %v164_v37 = vld [vmem:[#allocation2 + $0x2a0] sm:$0xff]  ;;  %v178_v38 = vld [vmem:[#allocation2 + $0x310] sm:$0xff]  ;;  %v161_v39 = vld [vmem:[#allocation2 + $0x288] sm:$0xff] }
  0x48   :  { %264 = vmatprep.subr.mxu0 %v201_v63  ;;  %334 = vmatpush2.msra.mxu1 %v206_v8  ;;  %v175_v40 = vld [vmem:[#allocation2 + $0x2f8] sm:$0xff]  ;;  %v160_v41 = vld [vmem:[#allocation2 + $0x280] sm:$0xff]  ;;  %v174_v42 = vld [vmem:[#allocation2 + $0x2f0] sm:$0xff] }
  0x49   :  { %265 = vmatpush2.msra.mxu0 %v200_v1  ;;  %335 = vmatprep.subr.mxu1 %v203_v10  ;;  %v157_v43 = vld [vmem:[#allocation2 + $0x268] sm:$0xff]  ;;  %v171_v44 = vld [vmem:[#allocation2 + $0x2d8] sm:$0xff]  ;;  %v156_v45 = vld [vmem:[#allocation2 + $0x260] sm:$0xff] }
  0x4a   :  { %266 = vmatprep.subr.mxu0 %v197_v3  ;;  %336 = vmatpush2.msra.mxu1 %v202_v12  ;;  %v170_v46 = vld [vmem:[#allocation2 + $0x2d0] sm:$0xff]  ;;  %v153_v47 = vld [vmem:[#allocation2 + $0x248] sm:$0xff]  ;;  %v167_v48 = vld [vmem:[#allocation2 + $0x2b8] sm:$0xff] }
  0x4b   :  { %267 = vmatpush2.msra.mxu0 %v196_v5  ;;  %337 = vmatprep.subr.mxu1 %v199_v14  ;;  %v152_v49 = vld [vmem:[#allocation2 + $0x240] sm:$0xff]  ;;  %v166_v50 = vld [vmem:[#allocation2 + $0x2b0] sm:$0xff]  ;;  %v149_v51 = vld [vmem:[#allocation2 + $0x228] sm:$0xff] }
  0x4c   :  { %268 = vmatprep.subr.mxu0 %v193_v7  ;;  %338 = vmatpush2.msra.mxu1 %v198_v16  ;;  %v163_v52 = vld [vmem:[#allocation2 + $0x298] sm:$0xff]  ;;  %v148_v53 = vld [vmem:[#allocation2 + $0x220] sm:$0xff]  ;;  %v162_v54 = vld [vmem:[#allocation2 + $0x290] sm:$0xff] }
  0x4d   :  { %269 = vmatpush2.msra.mxu0 %v192_v9  ;;  %339 = vmatprep.subr.mxu1 %v195_v18  ;;  %v145_v55 = vld [vmem:[#allocation2 + $0x208] sm:$0xff]  ;;  %v159_v56 = vld [vmem:[#allocation2 + $0x278] sm:$0xff]  ;;  %v144_v57 = vld [vmem:[#allocation2 + $0x200] sm:$0xff] }
  0x4e   :  { %270 = vmatprep.subr.mxu0 %v189_v11  ;;  %340 = vmatpush2.msra.mxu1 %v194_v20  ;;  %v158_v58 = vld [vmem:[#allocation2 + $0x270] sm:$0xff]  ;;  %v77_v59 = vld [vmem:[%s1142_s0] sm:$0xff]  ;;  %v155_v60 = vld [vmem:[#allocation2 + $0x258] sm:$0xff] }
  0x4f   :  { %271 = vmatpush2.msra.mxu0 %v188_v13  ;;  %341 = vmatprep.subr.mxu1 %v191_v22  ;;  %v154_v61 = vld [vmem:[#allocation2 + $0x250] sm:$0xff]  ;;  %v151_v62 = vld [vmem:[#allocation2 + $0x238] sm:$0xff]  ;;  %v461_v63 = vld [vmem:[#allocation4 + $0x1e8] sm:$0xff] }
  0x50   :  { %272 = vmatprep.subr.mxu0 %v185_v15  ;;  %342 = vmatpush2.msra.mxu1 %v190_v24  ;;  %v150_v0 = vld [vmem:[#allocation2 + $0x230] sm:$0xff]  ;;  %v460_v1 = vld [vmem:[#allocation4 + $0x1e0] sm:$0xff]  ;;  %v147_v2 = vld [vmem:[#allocation2 + $0x218] sm:$0xff] }
  0x51   :  { %273 = vmatpush2.msra.mxu0 %v184_v17  ;;  %343 = vmatprep.subr.mxu1 %v187_v26  ;;  %v457_v3 = vld [vmem:[#allocation4 + $0x1c8] sm:$0xff]  ;;  %v146_v4 = vld [vmem:[#allocation2 + $0x210] sm:$0xff]  ;;  %v456_v5 = vld [vmem:[#allocation4 + $0x1c0] sm:$0xff] }
  0x52   :  { %274 = vmatprep.subr.mxu0 %v181_v19  ;;  %344 = vmatpush2.msra.mxu1 %v186_v28  ;;  %v463_v6 = vld [vmem:[#allocation4 + $0x1f8] sm:$0xff]  ;;  %v462_v7 = vld [vmem:[#allocation4 + $0x1f0] sm:$0xff]  ;;  %v453_v8 = vld [vmem:[#allocation4 + $0x1a8] sm:$0xff] }
  0x53   :  { %275 = vmatpush2.msra.mxu0 %v180_v21  ;;  %345 = vmatprep.subr.mxu1 %v183_v30  ;;  %v459_v9 = vld [vmem:[#allocation4 + $0x1d8] sm:$0xff]  ;;  %v452_v10 = vld [vmem:[#allocation4 + $0x1a0] sm:$0xff]  ;;  %v458_v11 = vld [vmem:[#allocation4 + $0x1d0] sm:$0xff] }
  0x54   :  { %276 = vmatprep.subr.mxu0 %v177_v23  ;;  %346 = vmatpush2.msra.mxu1 %v182_v32  ;;  %v449_v12 = vld [vmem:[#allocation4 + $0x188] sm:$0xff]  ;;  %v455_v13 = vld [vmem:[#allocation4 + $0x1b8] sm:$0xff]  ;;  %v454_v14 = vld [vmem:[#allocation4 + $0x1b0] sm:$0xff] }
  0x55   :  { %277 = vmatpush2.msra.mxu0 %v176_v25  ;;  %347 = vmatprep.subr.mxu1 %v179_v34  ;;  %v451_v15 = vld [vmem:[#allocation4 + $0x198] sm:$0xff]  ;;  %v448_v16 = vld [vmem:[#allocation4 + $0x180] sm:$0xff]  ;;  %v450_v17 = vld [vmem:[#allocation4 + $0x190] sm:$0xff] }
  0x56   :  { %278 = vmatprep.subr.mxu0 %v173_v27  ;;  %294 = vmatprep.mubr.f32.mxu0 %v78_v36  ;;  %v445_v18 = vld [vmem:[#allocation4 + $0x168] sm:$0xff]  ;;  %v447_v19 = vld [vmem:[#allocation4 + $0x178] sm:$0xff]  ;;  %v444_v20 = vld [vmem:[#allocation4 + $0x160] sm:$0xff] }
  0x57   :  { %279 = vmatpush2.msra.mxu0 %v172_v29  ;;  %348 = vmatpush2.msra.mxu1 %v178_v38  ;;  %v446_v21 = vld [vmem:[#allocation4 + $0x170] sm:$0xff]  ;;  %v441_v22 = vld [vmem:[#allocation4 + $0x148] sm:$0xff]  ;;  %v443_v23 = vld [vmem:[#allocation4 + $0x158] sm:$0xff] }
  0x58   :  { %280 = vmatprep.subr.mxu0 %v169_v31  ;;  %349 = vmatprep.subr.mxu1 %v175_v40  ;;  %v440_v24 = vld [vmem:[#allocation4 + $0x140] sm:$0xff]  ;;  %v442_v25 = vld [vmem:[#allocation4 + $0x150] sm:$0xff]  ;;  %v437_v26 = vld [vmem:[#allocation4 + $0x128] sm:$0xff] }
  0x59   :  { %281 = vmatpush2.msra.mxu0 %v168_v33  ;;  %350 = vmatpush2.msra.mxu1 %v174_v42  ;;  %v439_v27 = vld [vmem:[#allocation4 + $0x138] sm:$0xff]  ;;  %v436_v28 = vld [vmem:[#allocation4 + $0x120] sm:$0xff]  ;;  %v438_v29 = vld [vmem:[#allocation4 + $0x130] sm:$0xff] }
  0x5a   :  { %282 = vmatprep.subr.mxu0 %v165_v35  ;;  %351 = vmatprep.subr.mxu1 %v171_v44  ;;  %v433_v30 = vld [vmem:[#allocation4 + $0x108] sm:$0xff]  ;;  %v435_v31 = vld [vmem:[#allocation4 + $0x118] sm:$0xff]  ;;  %v432_v32 = vld [vmem:[#allocation4 + $0x100] sm:$0xff] }
  0x5b   :  { %283 = vmatpush2.msra.mxu0 %v164_v37  ;;  %352 = vmatpush2.msra.mxu1 %v170_v46  ;;  %v434_v33 = vld [vmem:[#allocation4 + $0x110] sm:$0xff]  ;;  %v429_v34 = vld [vmem:[#allocation4 + $0xe8] sm:$0xff]  ;;  %v431_v35 = vld [vmem:[#allocation4 + $0xf8] sm:$0xff] }
  0x5c   :  { %284 = vmatprep.subr.mxu0 %v161_v39  ;;  %353 = vmatprep.subr.mxu1 %v167_v48  ;;  %v430_v37 = vld [vmem:[#allocation4 + $0xf0] sm:$0xff]  ;;  %v425_v38 = vld [vmem:[#allocation4 + $0xc8] sm:$0xff]  ;;  %v427_v39 = vld [vmem:[#allocation4 + $0xd8] sm:$0xff] }
  0x5d   :  { %285 = vmatpush2.msra.mxu0 %v160_v41  ;;  %354 = vmatpush2.msra.mxu1 %v166_v50  ;;  %v424_v40 = vld [vmem:[#allocation4 + $0xc0] sm:$0xff]  ;;  %v426_v41 = vld [vmem:[#allocation4 + $0xd0] sm:$0xff]  ;;  %v421_v42 = vld [vmem:[#allocation4 + $0xa8] sm:$0xff] }
  0x5e   :  { %286 = vmatprep.subr.mxu0 %v157_v43  ;;  %355 = vmatprep.subr.mxu1 %v163_v52  ;;  %v423_v43 = vld [vmem:[#allocation4 + $0xb8] sm:$0xff]  ;;  %v420_v44 = vld [vmem:[#allocation4 + $0xa0] sm:$0xff]  ;;  %v417_v46 = vld [vmem:[#allocation4 + $0x88] sm:$0xff] }
  0x5f   :  { %287 = vmatpush2.msra.mxu0 %v156_v45  ;;  %356 = vmatpush2.msra.mxu1 %v162_v54  ;;  %v422_v45 = vld [vmem:[#allocation4 + $0xb0] sm:$0xff]  ;;  %v416_v48 = vld [vmem:[#allocation4 + $0x80] sm:$0xff]  ;;  %v413_v50 = vld [vmem:[#allocation4 + $0x68] sm:$0xff] }
  0x60   :  { %288 = vmatprep.subr.mxu0 %v153_v47  ;;  %357 = vmatprep.subr.mxu1 %v159_v56  ;;  %v419_v47 = vld [vmem:[#allocation4 + $0x98] sm:$0xff]  ;;  %v412_v52 = vld [vmem:[#allocation4 + $0x60] sm:$0xff]  ;;  %v409_v54 = vld [vmem:[#allocation4 + $0x48] sm:$0xff] }
  0x61   :  { %289 = vmatpush2.msra.mxu0 %v152_v49  ;;  %358 = vmatpush2.msra.mxu1 %v158_v58  ;;  %v418_v49 = vld [vmem:[#allocation4 + $0x90] sm:$0xff]  ;;  %v408_v56 = vld [vmem:[#allocation4 + $0x40] sm:$0xff]  ;;  %v405_v58 = vld [vmem:[#allocation4 + $0x28] sm:$0xff] }
  0x62   :  { %290 = vmatprep.subr.mxu0 %v149_v51  ;;  %359 = vmatprep.subr.mxu1 %v155_v60  ;;  %v415_v51 = vld [vmem:[#allocation4 + $0x78] sm:$0xff]  ;;  %v404_v60 = vld [vmem:[#allocation4 + $0x20] sm:$0xff] }
  0x63   :  { %291 = vmatpush2.msra.mxu0 %v148_v53  ;;  %360 = vmatpush2.msra.mxu1 %v154_v61  ;;  %v414_v53 = vld [vmem:[#allocation4 + $0x70] sm:$0xff] }
  0x64   :  { %292 = vmatprep.subr.mxu0 %v145_v55  ;;  %365 = vmatprep.mubr.f32.mxu1 %v78_v36  ;;  %v428_v36 = vld [vmem:[#allocation4 + $0xe0] sm:$0xff]  ;;  %v411_v55 = vld [vmem:[#allocation4 + $0x58] sm:$0xff]  ;;  %v406_v61 = vld [vmem:[#allocation4 + $0x30] sm:$0xff] }
  0x65   :  { %293 = vmatpush2.msra.mxu0 %v144_v57  ;;  %361 = vmatprep.subr.mxu1 %v151_v62  ;;  %v410_v57 = vld [vmem:[#allocation4 + $0x50] sm:$0xff]  ;;  %v401_v62 = vld [vmem:[#allocation4 + $0x8] sm:$0xff] }
  0x66   :  { %295 = vmatmul.mubr.f32.vlgmr.msra.gmra.mxu0 %v77_v59  ;;  %550 = vmatprep.subr.mxu0 %v461_v63  ;;  %v403_v63 = vld [vmem:[#allocation4 + $0x18] sm:$0xff] }
  0x67   :  { %362 = vmatpush2.msra.mxu1 %v150_v0  ;;  %551 = vmatpush1.msra.mxu0 %v460_v1  ;;  %v400_v0 = vld [vmem:[#allocation4] sm:$0xff]  ;;  %v402_v1 = vld [vmem:[#allocation4 + $0x10] sm:$0xff] }
  0x68   :  { %363 = vmatprep.subr.mxu1 %v147_v2  ;;  %552 = vmatprep.subr.mxu0 %v457_v3  ;;  %v525_v2 = vld [vmem:[#allocation4 + $0x3e8] sm:$0xff]  ;;  %v527_v3 = vld [vmem:[#allocation4 + $0x3f8] sm:$0xff] }
  0x69   :  { %364 = vmatpush2.msra.mxu1 %v146_v4  ;;  %553 = vmatpush1.msra.mxu0 %v456_v5  ;;  %v524_v4 = vld [vmem:[#allocation4 + $0x3e0] sm:$0xff]  ;;  %v526_v5 = vld [vmem:[#allocation4 + $0x3f0] sm:$0xff] }
  0x6a   :  { %366 = vmatmul.mubr.f32.vlgmr.msra.gmra.mxu1 %v77_v59  ;;  %621 = vmatprep.subr.mxu1 %v463_v6  ;;  %v407_v59 = vld [vmem:[#allocation4 + $0x38] sm:$0xff]  ;;  %v521_v6 = vld [vmem:[#allocation4 + $0x3c8] sm:$0xff] }
  0x6b   :  { %622 = vmatpush1.msra.mxu1 %v462_v7  ;;  %554 = vmatprep.subr.mxu0 %v453_v8  ;;  %v523_v7 = vld [vmem:[#allocation4 + $0x3d8] sm:$0xff]  ;;  %v520_v8 = vld [vmem:[#allocation4 + $0x3c0] sm:$0xff] }
  0x6c   :  { %623 = vmatprep.subr.mxu1 %v459_v9  ;;  %555 = vmatpush1.msra.mxu0 %v452_v10  ;;  %v522_v9 = vld [vmem:[#allocation4 + $0x3d0] sm:$0xff]  ;;  %v517_v10 = vld [vmem:[#allocation4 + $0x3a8] sm:$0xff] }
  0x6d   :  { %624 = vmatpush1.msra.mxu1 %v458_v11  ;;  %556 = vmatprep.subr.mxu0 %v449_v12  ;;  %v519_v11 = vld [vmem:[#allocation4 + $0x3b8] sm:$0xff]  ;;  %v516_v12 = vld [vmem:[#allocation4 + $0x3a0] sm:$0xff] }
  0x6e   :  { %625 = vmatprep.subr.mxu1 %v455_v13  ;;  %557 = vmatpush1.msra.mxu0 %v448_v16  ;;  %v518_v13 = vld [vmem:[#allocation4 + $0x3b0] sm:$0xff]  ;;  %v512_v16 = vld [vmem:[#allocation4 + $0x380] sm:$0xff] }
  0x6f   :  { %626 = vmatpush1.msra.mxu1 %v454_v14  ;;  %558 = vmatprep.subr.mxu0 %v445_v18  ;;  %v513_v14 = vld [vmem:[#allocation4 + $0x388] sm:$0xff] }
  0x70   :  { %627 = vmatprep.subr.mxu1 %v451_v15  ;;  %559 = vmatpush1.msra.mxu0 %v444_v20  ;;  %v515_v15 = vld [vmem:[#allocation4 + $0x398] sm:$0xff]  ;;  %v509_v18 = vld [vmem:[#allocation4 + $0x368] sm:$0xff]  ;;  %v508_v20 = vld [vmem:[#allocation4 + $0x360] sm:$0xff] }
  0x71   :  { %628 = vmatpush1.msra.mxu1 %v450_v17  ;;  %560 = vmatprep.subr.mxu0 %v441_v22  ;;  %v514_v17 = vld [vmem:[#allocation4 + $0x390] sm:$0xff]  ;;  %v505_v22 = vld [vmem:[#allocation4 + $0x348] sm:$0xff] }
  0x72   :  { %629 = vmatprep.subr.mxu1 %v447_v19  ;;  %561 = vmatpush1.msra.mxu0 %v440_v24  ;;  %v511_v19 = vld [vmem:[#allocation4 + $0x378] sm:$0xff]  ;;  %v504_v24 = vld [vmem:[#allocation4 + $0x340] sm:$0xff] }
  0x73   :  { %630 = vmatpush1.msra.mxu1 %v446_v21  ;;  %562 = vmatprep.subr.mxu0 %v437_v26  ;;  %v510_v21 = vld [vmem:[#allocation4 + $0x370] sm:$0xff]  ;;  %v501_v26 = vld [vmem:[#allocation4 + $0x328] sm:$0xff] }
  0x74   :  { %631 = vmatprep.subr.mxu1 %v443_v23  ;;  %563 = vmatpush1.msra.mxu0 %v436_v28  ;;  %v507_v23 = vld [vmem:[#allocation4 + $0x358] sm:$0xff]  ;;  %v500_v28 = vld [vmem:[#allocation4 + $0x320] sm:$0xff] }
  0x75   :  { %632 = vmatpush1.msra.mxu1 %v442_v25  ;;  %564 = vmatprep.subr.mxu0 %v433_v30  ;;  %v506_v25 = vld [vmem:[#allocation4 + $0x350] sm:$0xff]  ;;  %v497_v30 = vld [vmem:[#allocation4 + $0x308] sm:$0xff] }
  0x76   :  { %633 = vmatprep.subr.mxu1 %v439_v27  ;;  %565 = vmatpush1.msra.mxu0 %v432_v32  ;;  %v503_v27 = vld [vmem:[#allocation4 + $0x338] sm:$0xff]  ;;  %v496_v32 = vld [vmem:[#allocation4 + $0x300] sm:$0xff] }
  0x77   :  { %634 = vmatpush1.msra.mxu1 %v438_v29  ;;  %566 = vmatprep.subr.mxu0 %v429_v34  ;;  %v502_v29 = vld [vmem:[#allocation4 + $0x330] sm:$0xff]  ;;  %v493_v34 = vld [vmem:[#allocation4 + $0x2e8] sm:$0xff] }
  0x78   :  { %635 = vmatprep.subr.mxu1 %v435_v31  ;;  %567 = vmatpush1.msra.mxu0 %v428_v36  ;;  %v499_v31 = vld [vmem:[#allocation4 + $0x318] sm:$0xff]  ;;  %v492_v36 = vld [vmem:[#allocation4 + $0x2e0] sm:$0xff] }
  0x79   :  { %636 = vmatpush1.msra.mxu1 %v434_v33  ;;  %568 = vmatprep.subr.mxu0 %v425_v38  ;;  %v498_v33 = vld [vmem:[#allocation4 + $0x310] sm:$0xff]  ;;  %v489_v38 = vld [vmem:[#allocation4 + $0x2c8] sm:$0xff] }
  0x7a   :  { %637 = vmatprep.subr.mxu1 %v431_v35  ;;  %569 = vmatpush1.msra.mxu0 %v424_v40  ;;  %v495_v35 = vld [vmem:[#allocation4 + $0x2f8] sm:$0xff]  ;;  %v488_v40 = vld [vmem:[#allocation4 + $0x2c0] sm:$0xff] }
  0x7b   :  { %638 = vmatpush1.msra.mxu1 %v430_v37  ;;  %570 = vmatprep.subr.mxu0 %v421_v42  ;;  %v494_v37 = vld [vmem:[#allocation4 + $0x2f0] sm:$0xff]  ;;  %v485_v42 = vld [vmem:[#allocation4 + $0x2a8] sm:$0xff] }
  0x7c   :  { %639 = vmatprep.subr.mxu1 %v427_v39  ;;  %571 = vmatpush1.msra.mxu0 %v420_v44  ;;  %v491_v39 = vld [vmem:[#allocation4 + $0x2d8] sm:$0xff]  ;;  %v484_v44 = vld [vmem:[#allocation4 + $0x2a0] sm:$0xff] }
  0x7d   :  { %640 = vmatpush1.msra.mxu1 %v426_v41  ;;  %572 = vmatprep.subr.mxu0 %v417_v46  ;;  %v490_v41 = vld [vmem:[#allocation4 + $0x2d0] sm:$0xff]  ;;  %v481_v46 = vld [vmem:[#allocation4 + $0x288] sm:$0xff] }
  0x7e   :  { %641 = vmatprep.subr.mxu1 %v423_v43  ;;  %573 = vmatpush1.msra.mxu0 %v416_v48  ;;  %v487_v43 = vld [vmem:[#allocation4 + $0x2b8] sm:$0xff]  ;;  %v480_v48 = vld [vmem:[#allocation4 + $0x280] sm:$0xff] }
  0x7f   :  { %642 = vmatpush1.msra.mxu1 %v422_v45  ;;  %574 = vmatprep.subr.mxu0 %v413_v50  ;;  %v486_v45 = vld [vmem:[#allocation4 + $0x2b0] sm:$0xff]  ;;  %v477_v50 = vld [vmem:[#allocation4 + $0x268] sm:$0xff] }
  0x80   :  { %643 = vmatprep.subr.mxu1 %v419_v47  ;;  %575 = vmatpush1.msra.mxu0 %v412_v52  ;;  %v483_v47 = vld [vmem:[#allocation4 + $0x298] sm:$0xff]  ;;  %v476_v52 = vld [vmem:[#allocation4 + $0x260] sm:$0xff] }
  0x81   :  { %644 = vmatpush1.msra.mxu1 %v418_v49  ;;  %576 = vmatprep.subr.mxu0 %v409_v54  ;;  %v482_v49 = vld [vmem:[#allocation4 + $0x290] sm:$0xff]  ;;  %v473_v54 = vld [vmem:[#allocation4 + $0x248] sm:$0xff] }
  0x82   :  { %645 = vmatprep.subr.mxu1 %v415_v51  ;;  %577 = vmatpush1.msra.mxu0 %v408_v56  ;;  %v479_v51 = vld [vmem:[#allocation4 + $0x278] sm:$0xff]  ;;  %v472_v56 = vld [vmem:[#allocation4 + $0x240] sm:$0xff] }
  0x83   :  { %646 = vmatpush1.msra.mxu1 %v414_v53  ;;  %578 = vmatprep.subr.mxu0 %v405_v58  ;;  %v478_v53 = vld [vmem:[#allocation4 + $0x270] sm:$0xff]  ;;  %v469_v58 = vld [vmem:[#allocation4 + $0x228] sm:$0xff] }
  0x84   :  { %647 = vmatprep.subr.mxu1 %v411_v55  ;;  %579 = vmatpush1.msra.mxu0 %v404_v60  ;;  %v475_v55 = vld [vmem:[#allocation4 + $0x258] sm:$0xff]  ;;  %v468_v60 = vld [vmem:[#allocation4 + $0x220] sm:$0xff] }
  0x85   :  { %648 = vmatpush1.msra.mxu1 %v410_v57  ;;  %580 = vmatprep.subr.mxu0 %v401_v62  ;;  %v474_v57 = vld [vmem:[#allocation4 + $0x250] sm:$0xff]  ;;  %v465_v62 = vld [vmem:[#allocation4 + $0x208] sm:$0xff] }
  0x86   :  { %649 = vmatprep.subr.mxu1 %v407_v59  ;;  %581 = vmatpush1.msra.mxu0 %v400_v0  ;;  %v471_v59 = vld [vmem:[#allocation4 + $0x238] sm:$0xff]  ;;  %v464_v0 = vld [vmem:[#allocation4 + $0x200] sm:$0xff] }
  0x87   :  { %650 = vmatpush1.msra.mxu1 %v406_v61  ;;  %582 = vmatprep.subr.mxu0 %v525_v2  ;;  %v470_v61 = vld [vmem:[#allocation4 + $0x230] sm:$0xff] }
  0x88   :  { %651 = vmatprep.subr.mxu1 %v403_v63  ;;  %583 = vmatpush2.msra.mxu0 %v524_v4  ;;  %v467_v63 = vld [vmem:[#allocation4 + $0x218] sm:$0xff]  ;;  %v466_v2 = vld [vmem:[#allocation4 + $0x210] sm:$0xff] }
  0x89   :  { %652 = vmatpush1.msra.mxu1 %v402_v1  ;;  %584 = vmatprep.subr.mxu0 %v521_v6  ;;  %v398_v1 = vld [vmem:[%s1143_s1 + $0x8] sm:$0xff]  ;;  %v208_v6 = vld [vmem:[%s1147_s5] sm:$0xf] }
  0x8a   :  { %653 = vmatprep.subr.mxu1 %v527_v3  ;;  %585 = vmatpush2.msra.mxu0 %v520_v8  ;;  %v210_v3 = vlaneseq }
  0x8b   :  { %654 = vmatpush2.msra.mxu1 %v526_v5  ;;  %586 = vmatprep.subr.mxu0 %v517_v10 }
  0x8c   :  { %655 = vmatprep.subr.mxu1 %v523_v7  ;;  %587 = vmatpush2.msra.mxu0 %v516_v12  ;;  %v1087_v4 = vshrl.u32 %v210_v3, 7 }
  0x8d   :  { %656 = vmatpush2.msra.mxu1 %v522_v9  ;;  %588 = vmatprep.subr.mxu0 %v513_v14 }
  0x8e   :  { %657 = vmatprep.subr.mxu1 %v519_v11  ;;  %589 = vmatpush2.msra.mxu0 %v512_v16  ;;  %v212_v5 = vsub.s32 0, %v1087_v4  ;;  %v216_v7 = vsub.s32 1, %v1087_v4 }
  0x8f   :  { %658 = vmatpush2.msra.mxu1 %v518_v13  ;;  %590 = vmatprep.subr.mxu0 %v509_v18  ;;  %v220_v18 = vsub.s32 2, %v1087_v4 }
  0x90   :  { %659 = vmatprep.subr.mxu1 %v515_v15  ;;  %591 = vmatpush2.msra.mxu0 %v508_v20  ;;  %v213_v8 = vrot.slane %v208_v6, %v212_v5  ;;  %v217_v9 = vrot.slane %v208_v6, %v216_v7  ;;  %v224_v15 = vsub.s32 3, %v1087_v4 }
  0x91   :  { %660 = vmatpush2.msra.mxu1 %v514_v17  ;;  %592 = vmatprep.subr.mxu0 %v505_v22 }
  0x92   :  { %661 = vmatprep.subr.mxu1 %v511_v19  ;;  %593 = vmatpush2.msra.mxu0 %v504_v24  ;;  %v225_v19 = vrot.slane %v208_v6, %v224_v15 }
  0x93   :  { %662 = vmatpush2.msra.mxu1 %v510_v21  ;;  %594 = vmatprep.subr.mxu0 %v501_v26  ;;  %v221_v21 = vrot.slane %v208_v6, %v220_v18 }
  0x94   :  { %663 = vmatprep.subr.mxu1 %v507_v23  ;;  %595 = vmatpush2.msra.mxu0 %v500_v28 }
  0x95   :  { %664 = vmatpush2.msra.mxu1 %v506_v25  ;;  %596 = vmatprep.subr.mxu0 %v497_v30 }
  0x96   :  { %665 = vmatprep.subr.mxu1 %v503_v27  ;;  %597 = vmatpush2.msra.mxu0 %v496_v32  ;;  %v79_v32 = vld [vmem:[%s1144_s2] sm:$0xff] }
  0x97   :  { %666 = vmatpush2.msra.mxu1 %v502_v29  ;;  %598 = vmatprep.subr.mxu0 %v493_v34 }
  0x98   :  { %667 = vmatprep.subr.mxu1 %v499_v31  ;;  %599 = vmatpush2.msra.mxu0 %v492_v36 }
  0x99   :  { %668 = vmatpush2.msra.mxu1 %v498_v33  ;;  %600 = vmatprep.subr.mxu0 %v489_v38 }
  0x9a   :  { %669 = vmatprep.subr.mxu1 %v495_v35  ;;  %601 = vmatpush2.msra.mxu0 %v488_v40 }
  0x9b   :  { %670 = vmatpush2.msra.mxu1 %v494_v37  ;;  %602 = vmatprep.subr.mxu0 %v485_v42  ;;  %v733_v42 = vld [vmem:[#allocation6 + $0x78] sm:$0xff] }
  0x9c   :  { %671 = vmatprep.subr.mxu1 %v491_v39  ;;  %603 = vmatpush2.msra.mxu0 %v484_v44  ;;  %v731_v44 = vld [vmem:[#allocation6 + $0x68] sm:$0xff] }
  0x9d   :  { %672 = vmatpush2.msra.mxu1 %v490_v41  ;;  %604 = vmatprep.subr.mxu0 %v481_v46  ;;  %v1002_v41 = vmov 0.0   ;;  %v729_v46 = vld [vmem:[#allocation6 + $0x58] sm:$0xff] }
  0x9e   :  { %673 = vmatprep.subr.mxu1 %v487_v43  ;;  %605 = vmatpush2.msra.mxu0 %v480_v48  ;;  %v732_v43 = vld [vmem:[#allocation6 + $0x70] sm:$0xff]  ;;  %v727_v48 = vld [vmem:[#allocation6 + $0x48] sm:$0xff] }
  0x9f   :  { %674 = vmatpush2.msra.mxu1 %v486_v45  ;;  %606 = vmatprep.subr.mxu0 %v477_v50  ;;  %v730_v45 = vld [vmem:[#allocation6 + $0x60] sm:$0xff]  ;;  %v725_v50 = vld [vmem:[#allocation6 + $0x38] sm:$0xff] }
  0xa0   :  { %675 = vmatprep.subr.mxu1 %v483_v47  ;;  %607 = vmatpush2.msra.mxu0 %v476_v52  ;;  %v728_v47 = vld [vmem:[#allocation6 + $0x50] sm:$0xff]  ;;  %v723_v52 = vld [vmem:[#allocation6 + $0x28] sm:$0xff] }
  0xa1   :  { %676 = vmatpush2.msra.mxu1 %v482_v49  ;;  %608 = vmatprep.subr.mxu0 %v473_v54  ;;  %v726_v49 = vld [vmem:[#allocation6 + $0x40] sm:$0xff]  ;;  %v721_v54 = vld [vmem:[#allocation6 + $0x18] sm:$0xff] }
  0xa2   :  { %677 = vmatprep.subr.mxu1 %v479_v51  ;;  %609 = vmatpush2.msra.mxu0 %v472_v56  ;;  %v724_v51 = vld [vmem:[#allocation6 + $0x30] sm:$0xff]  ;;  %v719_v56 = vld [vmem:[#allocation6 + $0x8] sm:$0xff] }
  0xa3   :  { %678 = vmatpush2.msra.mxu1 %v478_v53  ;;  %610 = vmatprep.subr.mxu0 %v469_v58  ;;  %v722_v53 = vld [vmem:[#allocation6 + $0x20] sm:$0xff] }
  0xa4   :  { %679 = vmatprep.subr.mxu1 %v475_v55  ;;  %611 = vmatpush2.msra.mxu0 %v468_v60  ;;  %v720_v55 = vld [vmem:[#allocation6 + $0x10] sm:$0xff]  ;;  %v528_v58 = vld [vmem:[%s1148_s6] sm:$0xf] }
  0xa5   :  { %680 = vmatpush2.msra.mxu1 %v474_v57  ;;  %612 = vmatprep.subr.mxu0 %v465_v62  ;;  %v718_v57 = vld [vmem:[#allocation6] sm:$0xff]  ;;  %v537_v60 = vrot.slane %v528_v58, %v216_v7  ;;  %v545_v6 = vrot.slane %v528_v58, %v224_v15 }
  0xa6   :  { %681 = vmatprep.subr.mxu1 %v471_v59  ;;  %613 = vmatpush2.msra.mxu0 %v464_v0  ;;  %v533_v59 = vrot.slane %v528_v58, %v212_v5  ;;  %v541_v5 = vrot.slane %v528_v58, %v220_v18 }
  0xa7   :  { %682 = vmatpush2.msra.mxu1 %v470_v61  ;;  %614 = vmatprep.mubr.f32.mxu0 %v398_v1 }
  0xa8   :  { %683 = vmatprep.subr.mxu1 %v467_v63  ;;  %685 = vmatprep.mubr.f32.mxu1 %v398_v1 }
  0xa9   :  { %684 = vmatpush2.msra.mxu1 %v466_v2  ;;  %855 = vmatprep.subr.mxu0 %v1002_v41 }
 0x126   :  { %v296_v10 = vpop.f32.mrf.mxu0 }
 0x127   :  { %v297_v11 = vadd.f32 %v296_v10, %v213_v8 }
 0x128   :  { %v298_v12 = vpop.f32.mrf.mxu0 }
 0x129   :  { %v831_v13 = vmul.f32 -1.442695, %v297_v11  ;;  %v299_v14 = vadd.f32 %v298_v12, %v217_v9 }
 0x12a   :  { %v367_v17 = vpop.f32.mrf.mxu1 }
 0x12b   :  { %899 = vpow2.f32 %v831_v13  ;;  %v832_v16 = vmul.f32 -1.442695, %v299_v14  ;;  %v368_v23 = vadd.f32 %v367_v17, %v221_v21 }
 0x12c   :  { %v369_v20 = vpop.f32.mrf.mxu1 }
 0x12d   :  { %901 = vpow2.f32 %v832_v16  ;;  %v370_v22 = vadd.f32 %v369_v20, %v225_v19 }
 0x12e   :  { %903 = vtanh.f32 %v368_v23 }
 0x12f   :  { %v833_v24 = vmul.f32 -1.442695, %v370_v22 }
 0x131   :  { %905 = vpow2.f32 %v833_v24 }
 0x138   :  { %v900_v25 = vpop.eup %899 }
 0x139   :  { %v375_v26 = vadd.f32 1.0, %v900_v25 }
 0x13a   :  { %v902_v27 = vpop.eup %901 }
 0x13b   :  { %907 = vrcp.f32 %v375_v26  ;;  %v381_v28 = vadd.f32 1.0, %v902_v27  ;;  %v904_v29 = vpop.eup %903  ;;  %v837_v26 = vld [vmem:[%s1150_s8] ss:$0 sm:$0xff] }
 0x13d   :  { %909 = vrcp.f32 %v381_v28 }
 0x13e   :  { %v906_v30 = vpop.eup %905 }
 0x13f   :  { %v388_v34 = vadd.f32 1.0, %v906_v30 }
 0x141   :  { %911 = vrcp.f32 %v388_v34 }
 0x148   :  { %v908_v31 = vpop.eup %907 }
 0x149   :  { %v392_v36 = vmul.f32 %v908_v31, %v904_v29 }
 0x14a   :  { %v910_v33 = vpop.eup %909 }
 0x14b   :  { %v391_v35 = vmul.f32 %v910_v33, %v79_v32 }
 0x14d   :  { %v393_v37 = vadd.f32 %v392_v36, %v391_v35 }
 0x14e   :  { %v912_v38 = vpop.eup %911 }
 0x14f   :  { %913 = vtanh.f32 %v393_v37  ;;  %397 = vst [vmem:[%s1154_s12] sm:$0xff] %v393_v37 }
 0x156   :  { %v399_v15 = vld [vmem:[%s1144_s2 + $0x8] sm:$0xff] }
 0x15c   :  { %v914_v39 = vpop.eup %913 }
 0x15d   :  { %v395_v40 = vmul.f32 %v914_v39, %v912_v38 }
 0x15f   :  { %396 = vst [vmem:[%s1153_s11] sm:$0xff] %v395_v40  ;;  %615 = vmatmul.mubr.f32.vlgmr.msra.gmra.mxu0 %v395_v40  ;;  %686 = vmatmul.mubr.f32.vlgmr.msra.gmra.mxu1 %v395_v40 }
 0x160   :  { %856 = vmatpush3.msra.mxu0 %v733_v42  ;;  %887 = vmatprep.mubr.msk.f32.mxu0 %vm1003_vm0, %v1002_v41 }
 0x161   :  { %857 = vmatprep.subr.mxu0 %v1002_v41 }
 0x162   :  { %858 = vmatpush3.msra.mxu0 %v732_v43 }
 0x163   :  { %859 = vmatprep.subr.mxu0 %v1002_v41 }
 0x164   :  { %860 = vmatpush3.msra.mxu0 %v731_v44 }
 0x165   :  { %861 = vmatprep.subr.mxu0 %v1002_v41 }
 0x166   :  { %862 = vmatpush3.msra.mxu0 %v730_v45 }
 0x167   :  { %863 = vmatprep.subr.mxu0 %v1002_v41 }
 0x168   :  { %864 = vmatpush3.msra.mxu0 %v729_v46 }
 0x169   :  { %865 = vmatprep.subr.mxu0 %v1002_v41 }
 0x16a   :  { %866 = vmatpush3.msra.mxu0 %v728_v47 }
 0x16b   :  { %867 = vmatprep.subr.mxu0 %v1002_v41 }
 0x16c   :  { %868 = vmatpush3.msra.mxu0 %v727_v48 }
 0x16d   :  { %869 = vmatprep.subr.mxu0 %v1002_v41 }
 0x16e   :  { %870 = vmatpush3.msra.mxu0 %v726_v49 }
 0x16f   :  { %871 = vmatprep.subr.mxu0 %v1002_v41 }
 0x170   :  { %872 = vmatpush3.msra.mxu0 %v725_v50 }
 0x171   :  { %873 = vmatprep.subr.mxu0 %v1002_v41 }
 0x172   :  { %874 = vmatpush3.msra.mxu0 %v724_v51 }
 0x173   :  { %875 = vmatprep.subr.mxu0 %v1002_v41 }
 0x174   :  { %876 = vmatpush3.msra.mxu0 %v723_v52 }
 0x175   :  { %877 = vmatprep.subr.mxu0 %v1002_v41 }
 0x176   :  { %878 = vmatpush3.msra.mxu0 %v722_v53 }
 0x177   :  { %879 = vmatprep.subr.mxu0 %v1002_v41 }
 0x178   :  { %880 = vmatpush3.msra.mxu0 %v721_v54 }
 0x179   :  { %881 = vmatprep.subr.mxu0 %v1002_v41 }
 0x17a   :  { %882 = vmatpush3.msra.mxu0 %v720_v55 }
 0x17b   :  { %883 = vmatprep.subr.mxu0 %v1002_v41 }
 0x17c   :  { %884 = vmatpush3.msra.mxu0 %v719_v56 }
 0x17d   :  { %885 = vmatprep.subr.mxu0 %v1002_v41 }
 0x17e   :  { %886 = vmatpush3.msra.mxu0 %v718_v57 }
 0x21f   :  { %v616_v61 = vpop.f32.mrf.mxu0  ;;  %v687_v2 = vpop.f32.mrf.mxu1 }
 0x220   :  { %v617_v62 = vadd.f32 %v616_v61, %v533_v59  ;;  %v688_v7 = vadd.f32 %v687_v2, %v541_v5 }
 0x221   :  { %v618_v63 = vpop.f32.mrf.mxu0  ;;  %v689_v8 = vpop.f32.mrf.mxu1 }
 0x222   :  { %v834_v0 = vmul.f32 -1.442695, %v617_v62  ;;  %v619_v1 = vadd.f32 %v618_v63, %v537_v60  ;;  %v690_v9 = vadd.f32 %v689_v8, %v545_v6 }
 0x224   :  { %915 = vpow2.f32 %v834_v0  ;;  %v835_v3 = vmul.f32 -1.442695, %v619_v1  ;;  %v836_v10 = vmul.f32 -1.442695, %v690_v9 }
 0x226   :  { %917 = vpow2.f32 %v835_v3 }
 0x227   :  { %919 = vpow2.f32 %v836_v10 }
 0x231   :  { %v916_v11 = vpop.eup %915 }
 0x232   :  { %v695_v12 = vadd.f32 1.0, %v916_v11 }
 0x233   :  { %v918_v13 = vpop.eup %917 }
 0x234   :  { %921 = vrcp.f32 %v695_v12  ;;  %v701_v14 = vadd.f32 1.0, %v918_v13  ;;  %v920_v16 = vpop.eup %919 }
 0x235   :  { %923 = vtanh.f32 %v688_v7  ;;  %v708_v4 = vadd.f32 1.0, %v920_v16 }
 0x236   :  { %925 = vrcp.f32 %v701_v14 }
 0x237   :  { %927 = vrcp.f32 %v708_v4 }
 0x241   :  { %v922_v17 = vpop.eup %921 }
 0x242   :  { %v924_v19 = vpop.eup %923 }
 0x243   :  { %v926_v20 = vpop.eup %925  ;;  %v712_v18 = vmul.f32 %v924_v19, %v922_v17 }
 0x244   :  { %v711_v21 = vmul.f32 %v926_v20, %v399_v15  ;;  %v928_v23 = vpop.eup %927 }
 0x246   :  { %v713_v22 = vadd.f32 %v712_v18, %v711_v21 }
 0x248   :  { %717 = vst [vmem:[%s1154_s12 + $0x8] sm:$0xff] %v713_v22  ;;  %929 = vtanh.f32 %v713_v22 }
 0x255   :  { %v930_v24 = vpop.eup %929 }
 0x256   :  { %v715_v25 = vmul.f32 %v930_v24, %v928_v23 }
 0x258   :  { %716 = vst [vmem:[%s1153_s11 + $0x8] sm:$0xff] %v715_v25  ;;  %888 = vmatmul.mubr.f32.vlgmr.msra.gmra.mxu0 %v715_v25  ;;  %812 = vst [vmem:[%s1152_s10] sm:$0xff] %v715_v25 }
 0x318   :  { %v807_v27 = vpop.f32.mrf.mxu0 }
 0x319   :  { %v808_v28 = vadd.f32 %v837_v26, %v807_v27 }
 0x31a   :  { %v889_v29 = vpop.f32.mrf.mxu0 }
 0x31b   :  { %811 = vst [vmem:[%s1151_s9] sm:$0xff] %v808_v28 }
 0x31c   :  { %829 = vsyncpa [#allocation3], 1 }
 0x31d   :  { %830 = vsyncpa [#allocation5], 1 }

</bundles_post_ra>
